<compile_context>
chip_gen: v5e
topology: v5e:2x2
jax: 0.10.0
libtpu: 0.0.40
codegen_flags: <defaults>
</compile_context>

<pallas_src>
import functools

import jax
import jax.numpy as jnp
import numpy as np
from jax.experimental import pallas as pl
from jax.experimental.pallas import tpu as pltpu


# ----------------------------- helpers --------------------------------------

def _round_up(x, m):
    return (x + m - 1) // m * m


_VMEM_BUDGET_BYTES = 32 * 1024 * 1024   # conservative: fits v7x (64 MiB phys) / v5e / v6e
_VMEM_LIMIT_BYTES = 48 * 1024 * 1024


def _choose_block_k(tb, cpad, d, x_itemsize, w_itemsize):
    """Largest 128-multiple K tile whose double-buffered streams fit the budget."""
    resident = 2 * (tb * cpad * 4 + tb * 4 + cpad * 4 + 8 * 128 * 4) + tb * cpad * 4
    per_k = 2 * (tb * x_itemsize + cpad * w_itemsize)   # double-buffered bytes per unit K
    tk = max(128, ((_VMEM_BUDGET_BYTES - resident) // per_k) // 128 * 128)
    return int(min(tk, _round_up(d, 128)))


def _masked_log_softmax(z, lane_ok):
    neg = jnp.float32(-1e30)
    zm = jnp.where(lane_ok, z, neg)
    zmax = jnp.max(zm, axis=-1, keepdims=True)
    zs = zm - zmax
    ez = jnp.where(lane_ok, jnp.exp(zs), 0.0)
    return zs - jnp.log(jnp.sum(ez, axis=-1, keepdims=True))


def _tile_masks(tile_shape, tile_i, tile_b, num_classes, batch):
    tb, cpad = tile_shape
    cls_ids = jax.lax.broadcasted_iota(jnp.int32, (tb, cpad), 1)
    row_ids = jax.lax.broadcasted_iota(jnp.int32, (tb, cpad), 0)
    lane_ok = cls_ids < num_classes                      # mask padded class lanes
    row_ok = (tile_i * tile_b + row_ids) < batch         # mask padded batch rows
    return cls_ids, lane_ok, lane_ok & row_ok


def _scalar_to_out_block(value):
    """Put a scalar at [0,0,0] of a lane-dense (1,8,128) f32 output block."""
    rid = jax.lax.broadcasted_iota(jnp.int32, (8, 128), 0)
    cid = jax.lax.broadcasted_iota(jnp.int32, (8, 128), 1)
    return jnp.where((rid == 0) & (cid == 0), value, jnp.float32(0.0))[None]


# ----------------------------- kernels --------------------------------------

def _base_only_kernel(num_classes, batch, s_ref, labels_ref, out_ref):
    """distillation_type == 'none': only the base CE loss; no teacher inputs."""
    i = pl.program_id(0)
    s = s_ref[...].astype(jnp.float32)
    tb, cpad = s.shape
    cls_ids, lane_ok, valid = _tile_masks((tb, cpad), i, tb, num_classes, batch)
    s_logp = _masked_log_softmax(s, lane_ok)
    onehot = (cls_ids == labels_ref[...]).astype(jnp.float32)
    base_sum = -jnp.sum(jnp.where(valid, onehot * s_logp, 0.0))
    out_ref[...] = _scalar_to_out_block(base_sum / batch)


def _distill_kernel(distillation_type, alpha, tau, num_classes, batch,
                    x_ref, w_ref, b_ref, s_ref, labels_ref, out_ref, acc_ref):
    # x_ref:      [TB, TK]   bf16 flattened teacher inputs
    # w_ref:      [TK, Cpad] bf16 teacher linear weight
    # b_ref:      [1,  Cpad] f32  teacher bias (resident)
    # s_ref:      [TB, Cpad] student logits (resident across K)
    # labels_ref: [TB, 1]    int32 labels (resident across K, -1 on padded rows)
    # out_ref:    [1, 8, 128] f32 per-batch-tile partial loss (lane 0 of row 0)
    # acc_ref:    [TB, Cpad] f32 teacher-logit accumulator (scratch)
    i = pl.program_id(0)
    k = pl.program_id(1)
    nk = pl.num_programs(1)

    @pl.when(k == 0)
    def _():
        acc_ref[...] = jnp.zeros_like(acc_ref)

    # bf16 x bf16 -> f32 accumulate on the MXU.
    acc_ref[...] += jnp.dot(x_ref[...], w_ref[...],
                            preferred_element_type=jnp.float32)

    @pl.when(k == nk - 1)
    def _():
        tb, cpad = acc_ref.shape
        cls_ids, lane_ok, valid = _tile_masks((tb, cpad), i, tb, num_classes, batch)

        s = s_ref[...].astype(jnp.float32)
        s_logp = _masked_log_softmax(s, lane_ok)

        # base criterion: mean CE with integer labels (padded rows masked).
        onehot = (cls_ids == labels_ref[...]).astype(jnp.float32)
        base = -jnp.sum(jnp.where(valid, onehot * s_logp, 0.0)) / batch

        t = acc_ref[...] + b_ref[...].astype(jnp.float32)    # teacher logits (f32)

        if distillation_type == 'soft':
            inv_tau = 1.0 / tau
            s_lp = _masked_log_softmax(s * inv_tau, lane_ok)
            t_lp = _masked_log_softmax(t * inv_tau, lane_ok)
            t_p = jnp.exp(t_lp)                              # reuse: single EUP exp
            # F.kl_div(s_lp, t_lp, 'sum', log_target=True) = sum(exp(t_lp)*(t_lp-s_lp))
            kd_sum = jnp.sum(jnp.where(valid, t_p * (t_lp - s_lp), 0.0))
            kd = kd_sum * (tau * tau) / (batch * num_classes)
        else:  # 'hard' -> CE against torch-style first-maximal-index argmax
            t_m = jnp.where(lane_ok, t, jnp.float32(-1e30))
            t_max = jnp.max(t_m, axis=-1, keepdims=True)
            first_max = jnp.min(jnp.where(t_m == t_max, cls_ids, cpad),
                                axis=-1, keepdims=True)
            t_onehot = (cls_ids == first_max).astype(jnp.float32)
            kd = -jnp.sum(jnp.where(valid, t_onehot * s_logp, 0.0)) / batch

        out_ref[...] = _scalar_to_out_block(base * (1.0 - alpha) + kd * alpha)


# ----------------------------- wrapper --------------------------------------

def distillation_loss(inputs, outputs, labels, teacher_w, teacher_b,
                      distillation_type='soft', alpha=0.5, tau=1.0,
                      block_b=None, block_k=None):
    """Pallas-backed equivalent of DistillationLoss.forward."""
    assert distillation_type in ('none', 'soft', 'hard')
    B, C = outputs.shape
    Cpad = _round_up(C, 128)                        # lane-dense class axis

    TB = block_b if block_b is not None else min(128, _round_up(B, 16))
    TB = max(16, _round_up(TB, 16))
    B_pad = _round_up(B, TB)
    nb = B_pad // TB

    s = outputs
    if (B_pad, Cpad) != (B, C):
        s = jnp.pad(s, ((0, B_pad - B), (0, Cpad - C)))
    labels2d = jnp.pad(labels.astype(jnp.int32).reshape(B, 1),
                       ((0, B_pad - B), (0, 0)), constant_values=-1)

    out_shape = jax.ShapeDtypeStruct((nb, 8, 128), jnp.float32)

    if distillation_type == 'none':
        # No teacher inputs at all -> no x/W HBM traffic.
        partials = pl.pallas_call(
            functools.partial(_base_only_kernel, C, B),
            out_shape=out_shape,
            grid=(nb,),
            in_specs=[pl.BlockSpec((TB, Cpad), lambda i: (i, 0)),
                      pl.BlockSpec((TB, 1), lambda i: (i, 0))],
            out_specs=pl.BlockSpec((1, 8, 128), lambda i: (i, 0, 0)),
            compiler_params=pltpu.CompilerParams(
                dimension_semantics=("parallel",)),
        )(s, labels2d)
        return jnp.sum(partials[:, 0, 0])

    # -------- teacher (linear classifier) path: tiled matmul over (B, D) ----
    x = inputs.reshape(B, -1)                       # glue: NCHW flatten, matches .flatten(1)
    D = x.shape[1]
    if x.dtype != jnp.bfloat16:                     # bf16 operands: half DMA bytes, full MXU rate
        x = x.astype(jnp.bfloat16)
    w = teacher_w
    if w.dtype != jnp.bfloat16:
        w = w.astype(jnp.bfloat16)

    TK = block_k if block_k is not None else _choose_block_k(TB, Cpad, D, 2, 2)
    TK = max(128, _round_up(TK, 128))
    D_pad = _round_up(D, TK)
    nk = D_pad // TK

    if (B_pad, D_pad) != (B, D):
        x = jnp.pad(x, ((0, B_pad - B), (0, D_pad - D)))
    if (D_pad, Cpad) != (D, C):
        w = jnp.pad(w, ((0, D_pad - D), (0, Cpad - C)))
    b = teacher_b.reshape(1, C).astype(jnp.float32)
    if Cpad != C:
        b = jnp.pad(b, ((0, 0), (0, Cpad - C)))

    kernel = functools.partial(_distill_kernel, distillation_type,
                               float(alpha), float(tau), C, B)
    partials = pl.pallas_call(
        kernel,
        out_shape=out_shape,
        grid=(nb, nk),
        in_specs=[
            pl.BlockSpec((TB, TK), lambda i, k: (i, k)),     # x tile        (bf16)
            pl.BlockSpec((TK, Cpad), lambda i, k: (k, 0)),   # teacher W     (bf16)
            pl.BlockSpec((1, Cpad), lambda i, k: (0, 0)),    # teacher bias  (f32, resident)
            pl.BlockSpec((TB, Cpad), lambda i, k: (i, 0)),   # student logits (resident / i)
            pl.BlockSpec((TB, 1), lambda i, k: (i, 0)),      # labels         (resident / i)
        ],
        out_specs=pl.BlockSpec((1, 8, 128), lambda i, k: (i, 0, 0)),
        scratch_shapes=[pltpu.VMEM((TB, Cpad), jnp.float32)],
        compiler_params=pltpu.CompilerParams(
            dimension_semantics=("parallel", "arbitrary"),
            vmem_limit_bytes=_VMEM_LIMIT_BYTES),
    )(x, w, b, s, labels2d)
    return jnp.sum(partials[:, 0, 0])


# ----------------------------- reference ------------------------------------

def _reference(inputs, outputs, labels, w, b, distillation_type, alpha, tau):
    """Pure-JAX reference mirroring the PyTorch forward (f32 teacher matmul)."""
    B, C = outputs.shape
    x = inputs.reshape(B, -1).astype(jnp.float32)
    outputs = outputs.astype(jnp.float32)
    logp = jax.nn.log_softmax(outputs, axis=1)
    base = -jnp.mean(logp[jnp.arange(B), labels])
    if distillation_type == 'none':
        return base
    t = jnp.dot(x, w.astype(jnp.float32),
                precision=jax.lax.Precision.HIGHEST) + b.astype(jnp.float32)
    if distillation_type == 'soft':
        s_lp = jax.nn.log_softmax(outputs / tau, axis=1)
        t_lp = jax.nn.log_softmax(t / tau, axis=1)
        kd = jnp.sum(jnp.exp(t_lp) * (t_lp - s_lp)) * (tau * tau) / outputs.size
    else:
        tl = jnp.argmax(t, axis=1)
        kd = -jnp.mean(logp[jnp.arange(B), tl])
    return base * (1.0 - alpha) + kd * alpha


# ----------------------------- test -----------------------------------------

if __name__ == "__main__":
    key = jax.random.PRNGKey(0)
    k_in, k_out, k_lab, k_w, k_b = jax.random.split(key, 5)

    B, Ci, H, W = 24, 4, 16, 16            # teacher inputs NCHW -> D = 1024
    num_classes = 16
    D = Ci * H * W

    # Teacher operands kept in bf16 (no wrapper-side f32 copies).
    inputs = jax.random.normal(k_in, (B, Ci, H, W), jnp.float32).astype(jnp.bfloat16)
    outputs = jax.random.normal(k_out, (B, num_classes), jnp.float32)   # student logits
    labels = jax.random.randint(k_lab, (B,), 0, num_classes, jnp.int32)

    teacher_w = (jax.random.normal(k_w, (D, num_classes), jnp.float32) * 0.05
                 ).astype(jnp.bfloat16)
    teacher_b = jax.random.normal(k_b, (num_classes,), jnp.float32) * 0.05

    alpha, tau = 0.5, 3.0
    ok = True

    # Explicit small tiles: exercises batch tiling (nb=2, with padded rows),
    # K accumulation (nk=4) and class-lane padding (16 -> 128).
    for dt in ('soft', 'hard', 'none'):
        got = distillation_loss(inputs, outputs, labels, teacher_w, teacher_b,
                                distillation_type=dt, alpha=alpha, tau=tau,
                                block_b=16, block_k=256)
        got = jax.block_until_ready(got)
        want = _reference(inputs, outputs, labels, teacher_w, teacher_b,
                          dt, alpha, tau)
        if not np.allclose(np.asarray(got), np.asarray(want), rtol=1e-3, atol=1e-3):
            ok = False
            print(f"MISMATCH ({dt}, tiled): kernel={float(got)} ref={float(want)}")

    # Default (auto-chosen) tiles for the 'soft' path.
    got = distillation_loss(inputs, outputs, labels, teacher_w, teacher_b,
                            distillation_type='soft', alpha=alpha, tau=tau)
    got = jax.block_until_ready(got)
    want = _reference(inputs, outputs, labels, teacher_w, teacher_b,
                      'soft', alpha, tau)
    if not np.allclose(np.asarray(got), np.asarray(want), rtol=1e-3, atol=1e-3):
        ok = False
        print(f"MISMATCH (soft, auto): kernel={float(got)} ref={float(want)}")

    if ok:
        print("KERNEL_OK")
</pallas_src>

<mosaic_0001>
module attributes {stable_mosaic.version = 11 : i64} {
  func.func @_distill_kernel(%arg0: i32, %arg1: i32, %arg2: memref<16x256xbf16, #tpu.memory_space<vmem>>, %arg3: memref<256x128xbf16, #tpu.memory_space<vmem>>, %arg4: memref<1x128xf32, #tpu.memory_space<vmem>>, %arg5: memref<16x128xf32, #tpu.memory_space<vmem>>, %arg6: memref<16x1xi32, #tpu.memory_space<vmem>>, %arg7: memref<1x8x128xf32, #tpu.memory_space<vmem>>, %arg8: memref<16x128xf32, #tpu.memory_space<vmem>>) attributes {dimension_semantics = [#tpu.dimension_semantics<parallel>, #tpu.dimension_semantics<arbitrary>], iteration_bounds = array<i64: 2, 4>, scalar_prefetch = 0 : i64, scratch_operands = 1 : i64, tpu.core_type = #tpu.core_type<tc>, window_params = [{transform_indices = @transform_0, window_bounds = array<i64: 16, 256>}, {transform_indices = @transform_1, window_bounds = array<i64: 256, 128>}, {pipeline_mode = #tpu.pipeline_mode<synchronous>, transform_indices = @transform_2, window_bounds = array<i64: 1, 128>}, {transform_indices = @transform_3, window_bounds = array<i64: 16, 128>}, {transform_indices = @transform_4, window_bounds = array<i64: 16, 1>}, {transform_indices = @transform_5, window_bounds = array<i64: 1, 8, 128>}]} {
    %c0_i32 = arith.constant 0 : i32
    %0 = arith.cmpi eq, %arg1, %c0_i32 : i32
    %1 = arith.extui %0 : i1 to i32
    %c0_i32_0 = arith.constant 0 : i32
    %2 = arith.cmpi ne, %1, %c0_i32_0 : i32
    scf.if %2 {
      %cst_9 = arith.constant 0.000000e+00 : f32
      %12 = vector.broadcast %cst_9 : f32 to vector<16x128xf32>
      %c0_10 = arith.constant 0 : index
      %c0_11 = arith.constant 0 : index
      %13 = vector.load %arg8[%c0_10, %c0_11] : memref<16x128xf32, #tpu.memory_space<vmem>>, vector<16x128xf32>
      tpu.vector_store %arg8[%c0_10, %c0_11], %12 {strides = array<i32>} : memref<16x128xf32, #tpu.memory_space<vmem>>, vector<16x128xf32>,
    } else {
    }
    %c0 = arith.constant 0 : index
    %c0_1 = arith.constant 0 : index
    %3 = vector.load %arg8[%c0, %c0_1] : memref<16x128xf32, #tpu.memory_space<vmem>>, vector<16x128xf32>
    %c0_2 = arith.constant 0 : index
    %c0_3 = arith.constant 0 : index
    %4 = vector.load %arg2[%c0_2, %c0_3] : memref<16x256xbf16, #tpu.memory_space<vmem>>, vector<16x256xbf16>
    %c0_4 = arith.constant 0 : index
    %c0_5 = arith.constant 0 : index
    %5 = vector.load %arg3[%c0_4, %c0_5] : memref<256x128xbf16, #tpu.memory_space<vmem>>, vector<256x128xbf16>
    %cst = arith.constant dense<0.000000e+00> : vector<16x128xf32>
    %6 = tpu.matmul %4, %5, %cst {dimension_numbers = #tpu.dot_dimension_numbers<[1], [0], [0], [1], [0, 0, 1, 1], [], []>} : vector<16x256xbf16>, vector<256x128xbf16>, vector<16x128xf32> -> vector<16x128xf32>
    %7 = arith.addf %3, %6 : vector<16x128xf32>
    %c0_6 = arith.constant 0 : index
    %c0_7 = arith.constant 0 : index
    %8 = vector.load %arg8[%c0_6, %c0_7] : memref<16x128xf32, #tpu.memory_space<vmem>>, vector<16x128xf32>
    tpu.vector_store %arg8[%c0_6, %c0_7], %7 {strides = array<i32>} : memref<16x128xf32, #tpu.memory_space<vmem>>, vector<16x128xf32>,
    %c3_i32 = arith.constant 3 : i32
    %9 = arith.cmpi eq, %arg1, %c3_i32 : i32
    %10 = arith.extui %9 : i1 to i32
    %c0_i32_8 = arith.constant 0 : i32
    %11 = arith.cmpi ne, %10, %c0_i32_8 : i32
    scf.if %11 {
      %12 = tpu.iota {dimensions = array<i32: 1>} : vector<16x128xi32>
      %13 = tpu.iota {dimensions = array<i32: 0>} : vector<16x128xi32>
      %c16_i32 = arith.constant 16 : i32
      %14 = vector.broadcast %c16_i32 : i32 to vector<16x128xi32>
      %15 = arith.cmpi slt, %12, %14 : vector<16x128xi32>
      %c16_i32_9 = arith.constant 16 : i32
      %16 = arith.muli %arg0, %c16_i32_9 : i32
      %17 = vector.broadcast %16 : i32 to vector<16x128xi32>
      %18 = arith.addi %17, %13 : vector<16x128xi32>
      %c24_i32 = arith.constant 24 : i32
      %19 = vector.broadcast %c24_i32 : i32 to vector<16x128xi32>
      %20 = arith.cmpi slt, %18, %19 : vector<16x128xi32>
      %21 = arith.andi %15, %20 : vector<16x128xi1>
      %c0_10 = arith.constant 0 : index
      %c0_11 = arith.constant 0 : index
      %22 = vector.load %arg5[%c0_10, %c0_11] : memref<16x128xf32, #tpu.memory_space<vmem>>, vector<16x128xf32>
      %cst_12 = arith.constant -1.000000e+30 : f32
      %23 = vector.broadcast %cst_12 : f32 to vector<16x128xf32>
      %24 = arith.select %15, %22, %23 : vector<16x128xi1>, vector<16x128xf32>
      %cst_13 = arith.constant dense<0xFF800000> : vector<16xf32>
      %25 = vector.multi_reduction <maximumf>, %24, %cst_13 [1] : vector<16x128xf32> to vector<16xf32>
      %26 = vector.shape_cast %25 : vector<16xf32> to vector<16x1xf32>
      %27 = vector.broadcast %26 : vector<16x1xf32> to vector<16x128xf32>
      %28 = arith.subf %24, %27 : vector<16x128xf32>
      %29 = math.exp %28 : vector<16x128xf32>
      %cst_14 = arith.constant 0.000000e+00 : f32
      %30 = vector.broadcast %cst_14 : f32 to vector<16x128xf32>
      %31 = arith.select %15, %29, %30 : vector<16x128xi1>, vector<16x128xf32>
      %cst_15 = arith.constant dense<0.000000e+00> : vector<16xf32>
      %32 = vector.multi_reduction <add>, %31, %cst_15 [1] : vector<16x128xf32> to vector<16xf32>
      %33 = vector.shape_cast %32 : vector<16xf32> to vector<16x1xf32>
      %34 = math.log %33 : vector<16x1xf32>
      %35 = vector.broadcast %34 : vector<16x1xf32> to vector<16x128xf32>
      %36 = arith.subf %28, %35 : vector<16x128xf32>
      %c0_16 = arith.constant 0 : index
      %c0_17 = arith.constant 0 : index
      %37 = vector.load %arg6[%c0_16, %c0_17] : memref<16x1xi32, #tpu.memory_space<vmem>>, vector<16x1xi32>
      %38 = vector.broadcast %37 : vector<16x1xi32> to vector<16x128xi32>
      %39 = arith.cmpi eq, %12, %38 : vector<16x128xi32>
      %40 = arith.extui %39 : vector<16x128xi1> to vector<16x128xi32>
      %41 = arith.sitofp %40 : vector<16x128xi32> to vector<16x128xf32>
      %42 = arith.mulf %41, %36 : vector<16x128xf32>
      %cst_18 = arith.constant 0.000000e+00 : f32
      %43 = vector.broadcast %cst_18 : f32 to vector<16x128xf32>
      %44 = arith.select %21, %42, %43 : vector<16x128xi1>, vector<16x128xf32>
      %45 = vector.shape_cast %44 : vector<16x128xf32> to vector<1x16x128xf32>
      %cst_19 = arith.constant dense<0.000000e+00> : vector<1xf32>
      %46 = vector.multi_reduction <add>, %45, %cst_19 [1, 2] : vector<1x16x128xf32> to vector<1xf32>
      %47 = vector.shape_cast %46 : vector<1xf32> to vector<1x1x1xf32>
      %48 = vector.extract %47[0, 0, 0] : f32 from vector<1x1x1xf32>
      %cst_20 = arith.constant 0.000000e+00 : f32
      %49 = arith.subf %cst_20, %48 : f32
      %cst_21 = arith.constant 2.400000e+01 : f32
      %50 = arith.divf %49, %cst_21 : f32
      %c0_22 = arith.constant 0 : index
      %c0_23 = arith.constant 0 : index
      %51 = vector.load %arg8[%c0_22, %c0_23] : memref<16x128xf32, #tpu.memory_space<vmem>>, vector<16x128xf32>
      %c0_24 = arith.constant 0 : index
      %c0_25 = arith.constant 0 : index
      %52 = vector.load %arg4[%c0_24, %c0_25] : memref<1x128xf32, #tpu.memory_space<vmem>>, vector<1x128xf32>
      %53 = vector.broadcast %52 : vector<1x128xf32> to vector<16x128xf32>
      %54 = arith.addf %51, %53 : vector<16x128xf32>
      %cst_26 = arith.constant 0.333333343 : f32
      %55 = vector.broadcast %cst_26 : f32 to vector<16x128xf32>
      %56 = arith.mulf %22, %55 : vector<16x128xf32>
      %cst_27 = arith.constant -1.000000e+30 : f32
      %57 = vector.broadcast %cst_27 : f32 to vector<16x128xf32>
      %58 = arith.select %15, %56, %57 : vector<16x128xi1>, vector<16x128xf32>
      %cst_28 = arith.constant dense<0xFF800000> : vector<16xf32>
      %59 = vector.multi_reduction <maximumf>, %58, %cst_28 [1] : vector<16x128xf32> to vector<16xf32>
      %60 = vector.shape_cast %59 : vector<16xf32> to vector<16x1xf32>
      %61 = vector.broadcast %60 : vector<16x1xf32> to vector<16x128xf32>
      %62 = arith.subf %58, %61 : vector<16x128xf32>
      %63 = math.exp %62 : vector<16x128xf32>
      %cst_29 = arith.constant 0.000000e+00 : f32
      %64 = vector.broadcast %cst_29 : f32 to vector<16x128xf32>
      %65 = arith.select %15, %63, %64 : vector<16x128xi1>, vector<16x128xf32>
      %cst_30 = arith.constant dense<0.000000e+00> : vector<16xf32>
      %66 = vector.multi_reduction <add>, %65, %cst_30 [1] : vector<16x128xf32> to vector<16xf32>
      %67 = vector.shape_cast %66 : vector<16xf32> to vector<16x1xf32>
      %68 = math.log %67 : vector<16x1xf32>
      %69 = vector.broadcast %68 : vector<16x1xf32> to vector<16x128xf32>
      %70 = arith.subf %62, %69 : vector<16x128xf32>
      %cst_31 = arith.constant 0.333333343 : f32
      %71 = vector.broadcast %cst_31 : f32 to vector<16x128xf32>
      %72 = arith.mulf %54, %71 : vector<16x128xf32>
      %cst_32 = arith.constant -1.000000e+30 : f32
      %73 = vector.broadcast %cst_32 : f32 to vector<16x128xf32>
      %74 = arith.select %15, %72, %73 : vector<16x128xi1>, vector<16x128xf32>
      %cst_33 = arith.constant dense<0xFF800000> : vector<16xf32>
      %75 = vector.multi_reduction <maximumf>, %74, %cst_33 [1] : vector<16x128xf32> to vector<16xf32>
      %76 = vector.shape_cast %75 : vector<16xf32> to vector<16x1xf32>
      %77 = vector.broadcast %76 : vector<16x1xf32> to vector<16x128xf32>
      %78 = arith.subf %74, %77 : vector<16x128xf32>
      %79 = math.exp %78 : vector<16x128xf32>
      %cst_34 = arith.constant 0.000000e+00 : f32
      %80 = vector.broadcast %cst_34 : f32 to vector<16x128xf32>
      %81 = arith.select %15, %79, %80 : vector<16x128xi1>, vector<16x128xf32>
      %cst_35 = arith.constant dense<0.000000e+00> : vector<16xf32>
      %82 = vector.multi_reduction <add>, %81, %cst_35 [1] : vector<16x128xf32> to vector<16xf32>
      %83 = vector.shape_cast %82 : vector<16xf32> to vector<16x1xf32>
      %84 = math.log %83 : vector<16x1xf32>
      %85 = vector.broadcast %84 : vector<16x1xf32> to vector<16x128xf32>
      %86 = arith.subf %78, %85 : vector<16x128xf32>
      %87 = math.exp %86 : vector<16x128xf32>
      %88 = arith.subf %86, %70 : vector<16x128xf32>
      %89 = arith.mulf %87, %88 : vector<16x128xf32>
      %cst_36 = arith.constant 0.000000e+00 : f32
      %90 = vector.broadcast %cst_36 : f32 to vector<16x128xf32>
      %91 = arith.select %21, %89, %90 : vector<16x128xi1>, vector<16x128xf32>
      %92 = vector.shape_cast %91 : vector<16x128xf32> to vector<1x16x128xf32>
      %cst_37 = arith.constant dense<0.000000e+00> : vector<1xf32>
      %93 = vector.multi_reduction <add>, %92, %cst_37 [1, 2] : vector<1x16x128xf32> to vector<1xf32>
      %94 = vector.shape_cast %93 : vector<1xf32> to vector<1x1x1xf32>
      %95 = vector.extract %94[0, 0, 0] : f32 from vector<1x1x1xf32>
      %cst_38 = arith.constant 9.000000e+00 : f32
      %96 = arith.mulf %95, %cst_38 : f32
      %cst_39 = arith.constant 3.840000e+02 : f32
      %97 = arith.divf %96, %cst_39 : f32
      %cst_40 = arith.constant 5.000000e-01 : f32
      %98 = arith.mulf %50, %cst_40 : f32
      %cst_41 = arith.constant 5.000000e-01 : f32
      %99 = arith.mulf %97, %cst_41 : f32
      %100 = arith.addf %98, %99 : f32
      %101 = tpu.iota {dimensions = array<i32: 0>} : vector<8x128xi32>
      %102 = tpu.iota {dimensions = array<i32: 1>} : vector<8x128xi32>
      %c0_i32_42 = arith.constant 0 : i32
      %103 = vector.broadcast %c0_i32_42 : i32 to vector<8x128xi32>
      %104 = arith.cmpi eq, %101, %103 : vector<8x128xi32>
      %c0_i32_43 = arith.constant 0 : i32
      %105 = vector.broadcast %c0_i32_43 : i32 to vector<8x128xi32>
      %106 = arith.cmpi eq, %102, %105 : vector<8x128xi32>
      %107 = arith.andi %104, %106 : vector<8x128xi1>
      %cst_44 = arith.constant 0.000000e+00 : f32
      %108 = vector.broadcast %100 : f32 to vector<8x128xf32>
      %109 = vector.broadcast %cst_44 : f32 to vector<8x128xf32>
      %110 = arith.select %107, %108, %109 : vector<8x128xi1>, vector<8x128xf32>
      %111 = vector.shape_cast %110 : vector<8x128xf32> to vector<1x8x128xf32>
      %c0_45 = arith.constant 0 : index
      %c0_46 = arith.constant 0 : index
      %c0_47 = arith.constant 0 : index
      %112 = vector.load %arg7[%c0_45, %c0_46, %c0_47] : memref<1x8x128xf32, #tpu.memory_space<vmem>>, vector<1x8x128xf32>
      tpu.vector_store %arg7[%c0_45, %c0_46, %c0_47], %111 {strides = array<i32>} : memref<1x8x128xf32, #tpu.memory_space<vmem>>, vector<1x8x128xf32>,
    } else {
    }
    return
  }
  func.func @transform_0(%arg0: i32, %arg1: i32) -> (i32, i32) {
    %c0_i32 = arith.constant 0 : i32
    return %arg0, %arg1 : i32, i32
  }
  func.func @transform_1(%arg0: i32, %arg1: i32) -> (i32, i32) {
    %c0_i32 = arith.constant 0 : i32
    %c0_i32_0 = arith.constant 0 : i32
    return %arg1, %c0_i32 : i32, i32
  }
  func.func @transform_2(%arg0: i32, %arg1: i32) -> (i32, i32) {
    %c0_i32 = arith.constant 0 : i32
    %c0_i32_0 = arith.constant 0 : i32
    %c0_i32_1 = arith.constant 0 : i32
    return %c0_i32, %c0_i32_0 : i32, i32
  }
  func.func @transform_3(%arg0: i32, %arg1: i32) -> (i32, i32) {
    %c0_i32 = arith.constant 0 : i32
    %c0_i32_0 = arith.constant 0 : i32
    return %arg0, %c0_i32 : i32, i32
  }
  func.func @transform_4(%arg0: i32, %arg1: i32) -> (i32, i32) {
    %c0_i32 = arith.constant 0 : i32
    %c0_i32_0 = arith.constant 0 : i32
    return %arg0, %c0_i32 : i32, i32
  }
  func.func @transform_5(%arg0: i32, %arg1: i32) -> (i32, i32, i32) {
    %c0_i32 = arith.constant 0 : i32
    %c0_i32_0 = arith.constant 0 : i32
    %c0_i32_1 = arith.constant 0 : i32
    return %arg0, %c0_i32, %c0_i32_0 : i32, i32, i32
  }
}

</mosaic_0001>

<bundles_post_ra>
// kernel: tpu_custom_call.1
= control target key start
LH: loop header
LB: loop body
LE: loop exit
PB: predicated region body
PF: predicated region fallthrough
CT: control target
= control target key end

     0   :  { %s1785_s0 = inlined_call_operand.hbm [shape: bf16[32,1024], index: 0, kind: input, shape index: {}]   ;;  %s1786_s1 = inlined_call_operand.hbm [shape: bf16[1024,128], index: 1, kind: input, shape index: {}]   ;;  %s1787_s2 = inlined_call_operand.vmem [shape: f32[1,128], index: 2, kind: input, shape index: {}]   ;;  %s1788_s3 = inlined_call_operand.vmem [shape: f32[32,128], index: 3, kind: input, shape index: {}]   ;;  %s1789_s4 = inlined_call_operand.vmem [shape: s32[32,1], index: 4, kind: input, shape index: {}]   ;;  %s1790_s5 = inlined_call_operand.hbm [shape: f32[2,8,128], index: 5, kind: output, shape index: {}]  }
   0x1   :  { %1797 = sst [smem:[#allocation18_spill]] %s1785_s0 }
   0x2   :  { %1798 = sst [smem:[#allocation19_spill]] %s1787_s2 }
   0x3   :  { %1799 = sst [smem:[#allocation20_spill]] %s1788_s3 }
   0x4   :  { %1800 = sst [smem:[#allocation21_spill]] %s1789_s4 }
   0x5   :  { %1801 = sst [smem:[#allocation22_spill]] %s1790_s5 }
   0x6   :  { %10 = vsyncpa [#allocation4], 0 }
   0x7   :  { %12 = vsyncpa [#allocation4 + $0x1], 0 }
   0x8   :  { %13 = vsyncpa [#allocation7], 0 }
   0x9   :  { %15 = vsyncpa [#allocation7 + $0x1], 0 }
   0xa   :  { %16 = vsyncpa [#allocation5], 0 }
   0xb   :  { %18 = vsyncpa [#allocation5 + $0x1], 0  ;;  %s1416_s18 = smov 0   ;;  %s1418_s19 = smov 0  }
   0xc   :  { %s1420_s20 = smov 0   ;;  %s1422_s21 = smov 0  }
   0xd   :  { %s1424_s22 = smov 0   ;;  %s1426_s23 = smov 0  }
   0xe   :  { %s1428_s24 = smov 0   ;;  %s1430_s25 = smov 0  }
   0xf   :  { %s1432_s26 = smov 0   ;;  %s1434_s27 = smov 0  }
  0x10   :  { %s1436_s28 = smov 0   ;;  %s1438_s29 = smov 0  }
  0x11   :  { %s1440_s30 = smov 0   ;;  %s1442_s6 = smov 0  }
  0x12 LB: > { %1802 = sst [smem:[#allocation12_spill]] %s1358_s27  ;;  %s33_s7 = sadd.s32 1, %s1366_s29  ;;  %s1374_s6 = sphi %s1442_s6, %s24_s6   ;;  %s1370_s30 = sphi %s1440_s30, %s1832_s30   ;;  %s1366_s29 = sphi %s1438_s29, %s1831_s29   ;;  %s1362_s28 = sphi %s1436_s28, %s1830_s28   ;;  %s1358_s27 = sphi %s1434_s27, %s1829_s27   ;;  %s1354_s26 = sphi %s1432_s26, %s1841_s26   ;;  %s1350_s25 = sphi %s1430_s25, %s1840_s25   ;;  %s1346_s24 = sphi %s1428_s24, %s1839_s24   ;;  %s1342_s23 = sphi %s1426_s23, %s1838_s23   ;;  %s1338_s22 = sphi %s1424_s22, %s1837_s22   ;;  %s1334_s21 = sphi %s1422_s21, %s1836_s21   ;;  %s1330_s20 = sphi %s1420_s20, %s1835_s20   ;;  %s1326_s19 = sphi %s1418_s19, %s1834_s19   ;;  %s1322_s18 = sphi %s1416_s18, %s1833_s18  }
  0x13   : > { %1803 = sst [smem:[#allocation13_spill]] %s1362_s28  ;;  %s36_s8 = sadd.s32 1, %s1370_s30 }
  0x14   : > { %1804 = sst [smem:[#allocation14_spill]] %s1366_s29  ;;  %p34_p0 = scmp.ge.s32.totalorder %s33_s7, 4 }
  0x15   : > { %1805 = sst [smem:[#allocation15_spill]] %s1370_s30  ;;  %s45_s9 = sadd.s32 1, %s1354_s26 }
  0x16   : > { %p52_p1 = scmp.ne.s32.totalorder %s1354_s26, %s1350_s25  ;;  %p53_p2 = scmp.eq.s32.totalorder %s1374_s6, 0 }
  0x17   : > { %s1843_s7 = smov (%p34_p0, %s33_s7), 0  ;;  %s1845_s8 = smov (!%p34_p0, %s36_s8), %s1370_s30 }
  0x18   : > { %1806 = sst [smem:[#allocation16_spill]] %s1843_s7  ;;  %s1497_s10 = ssub.s32 %s1366_s29, %s1843_s7 }
  0x19   : > { %p1501_p3 = por %p53_p2, %p52_p1  ;;  %p38_p4 = scmp.ge.s32.totalorder %s1845_s8, 2 }
  0x1a   : > { %p58_p5 = scmp.ne.s32.totalorder %s1350_s25, %s1346_s24  ;;  %s170_s12 = sadd.s32 1, %s1330_s20 }
  0x1b   : > { %s1847_s8 = smov (%p38_p4, %s1845_s8), 0  ;;  %p1793_p6 = scmp.lt.s32.totalorder %s1374_s6, 8 }
  0x1c   : > { %1808 = sst [smem:[#allocation17_spill]] %s1847_s8  ;;  %s210_s13 = sand.u32 1, %s1354_s26  }
  0x1d   : > { %s40_s14 = ssub.s32 %s1370_s30, %s1847_s8  ;;  %s863_s16 = sshll.u32 %s210_s13, 4 }
  0x1e   : > { %s42_s15 = sor.u32 %s1497_s10, %s40_s14  ;;  %p168_p7 = scmp.eq.s32.totalorder %s40_s14, 0 }
  0x1f   : > { %p43_p8 = scmp.eq.s32.totalorder %s42_s15, 0  ;;  %s865_s5 = sshll.u32 %s1366_s29, 1 }
  0x20   : > { %s1516_s17 = scalar_select %p168_p7, %s1330_s20, %s170_s12  }
  0x21   : > { %s1519_s7 = scalar_select %p43_p8, %s1354_s26, %s45_s9  }
  0x22   : > { %s960_s2 = sshll.u32 %s1370_s30, 4  ;;  %s214_s27 = scalar_lea.vmem [#allocation3], %s863_s16 }
  0x23   : > { %s225_s4 = sshll.u32 %s214_s27, 4  ;;  %s220_s3 = sadd.s32 %s960_s2, %s865_s5  ;;  %s226_s4 = int_to_ptr.vmem [resolvable:$true] %s225_s4 }
  0x24   : > { %s867_s28 = sshll.u32 %s220_s3, 2  ;;  %p995_p9 = pnand %p1793_p6, %p1501_p3 }
  0x25   : > { %s1809_s0 = sld [smem:[#allocation18_spill]]  ;;  %p871_p10 = scmp.ge.s32.totalorder %s1374_s6, 1 }
  0x26   : > { %s211_s2 = scalar_lea.sflag [#allocation4], %s210_s13  ;;  %s1376_s3 = smov 512  }
  0x27   : > { %s1377_s5 = smov 128   ;;  %s1378_s27 = smov 8  }
  0x28   : > { %p273_p11 = scmp.lt.s32.totalorder %s1374_s6, 9  ;;  %s859_s11 = sadd.s32 4294967295, %s1374_s6  }
  0x29   : > { %s860_s16 = sadd.s32 4294967294, %s1374_s6   ;;  %p59_p13 = scmp.eq.s32.totalorder %s859_s11, 0 }
  0x2a   : > { %p1532_p12 = pnand %p871_p10, %p273_p11  ;;  %p69_p0 = scmp.eq.s32.totalorder %s1497_s10, 0 }
  0x2b   : > { %s222_s9 = scalar_lea.hbm %s1809_s0, %s867_s28  ;;  %s71_s13 = sadd.s32 1, %s1342_s23 }
  0x2c   : > { %s223_s12 = sshll.u32 %s222_s9, 4  ;;  %p78_p1 = scmp.ne.s32.totalorder %s1342_s23, %s1338_s22  ;;  %s224_s12 = int_to_ptr.hbm [resolvable:$true] %s223_s12 }
  0x2d   : > { %997 = dma.hbm_to_vmem [thread:$0]  (!%p995_p9), %s224_s12, 256, %s226_s4, %s211_s2, %s1376_s3, %s1377_s5, %s1378_s27  }
  0x2e   : > { %p1545_p3 = por %p59_p13, %p58_p5  ;;  %p84_p4 = scmp.ne.s32.totalorder %s1338_s22, %s1334_s21 }
  0x2f   : > { %s1552_s4 = scalar_select %p69_p0, %s1342_s23, %s71_s13  }
  0x30   : > { %p1556_p7 = por %p78_p1, %p53_p2  ;;  %p1560_p8 = por %p84_p4, %p59_p13 }
  0x31   : > { %p180_p9 = scmp.ne.s32.totalorder %s1330_s20, %s1326_s19  ;;  %p181_p10 = scmp.eq.s32.totalorder %s859_s11, 7 }
  0x32   : > { %p186_p5 = scmp.ne.s32.totalorder %s1326_s19, %s1322_s18  ;;  %p187_p11 = scmp.eq.s32.totalorder %s860_s16, 7 }
  0x33   : > { %p1568_p6 = por %p181_p10, %p180_p9  ;;  %s235_s21 = sand.u32 1, %s1342_s23  }
  0x34   : > { %p1573_p0 = por %p187_p11, %p186_p5  ;;  %s868_s12 = sshll.u32 %s235_s21, 7 }
  0x35   : > { %s961_s2 = sshll.u32 %s1366_s29, 7  ;;  %s239_s0 = scalar_lea.vmem [#allocation6], %s868_s12 }
  0x36   : > { %s244_s27 = scalar_lea.hbm %s1786_s1, %s961_s2  ;;  %s247_s11 = sshll.u32 %s239_s0, 4  ;;  %s248_s11 = int_to_ptr.vmem [resolvable:$true] %s247_s11 }
  0x37   : > { %s245_s13 = sshll.u32 %s244_s27, 4  ;;  %p1816_p2 = scmp.lt.s32.totalorder %s1374_s6, 8  ;;  %s246_s13 = int_to_ptr.hbm [resolvable:$true] %s245_s13 }
  0x38   : > { %s236_s16 = scalar_lea.sflag [#allocation7], %s235_s21  ;;  %s1379_s8 = smov 64  }
  0x39   : > { %p998_p13 = pnand %p1816_p2, %p1556_p7  ;;  %s1380_s30 = smov 4  }
  0x3a   : > { %277 = sbr.rel (%p1532_p12) target bundleno = 770 (0x302), region = 40  ;;  %s279_s29 = sand.u32 (!%p1532_p12), 1, %s1350_s25  }
  0x3b   : > { %1000 = dma.hbm_to_vmem [thread:$0]  (!%p998_p13), %s246_s13, 2048, %s248_s11, %s236_s16, %s1379_s8, %s1379_s8, %s1380_s30  }
  0x3c   : > { %s872_s3 = sshll.u32 (!%p1532_p12), %s279_s29, 4  ;;  %s280_s2 = scalar_lea.sflag (!%p1532_p12), [#allocation4], %s279_s29 }
  0x3d   : > { %s1588_s5 = scalar_lea.vmem (!%p1532_p12), [#allocation3], %s872_s3 }
  0x3f   : > { %1309 = dma.done.wait (%p1545_p3), %s280_s2, 256  }
  0x40   : > { %1311 = vsyncadd (%p1545_p3), %s280_s2, 4294967040  ;;  %s289_s0 = sand.u32 1, %s1338_s22  }
  0x41   : > { %s873_s15 = sshll.u32 %s289_s0, 7  ;;  %s290_s30 = scalar_lea.sflag [#allocation7], %s289_s0 }
  0x42   : > { %s1595_s8 = scalar_lea.vmem [#allocation6], %s873_s15 }
  0x43   : > { %1313 = dma.done.wait (%p1560_p8), %s290_s30, 2048  }
  0x44   : > { %1315 = vsyncadd (%p1560_p8), %s290_s30, 4294965248  ;;  %s1817_s29 = sld [smem:[#allocation13_spill]]  ;;  %s333_s28 = sand.u32 1, %s1326_s19  }
  0x45   : > { %s1605_s14 = sshll.u32 %s333_s28, 3  ;;  %s1818_s11 = sld [smem:[#allocation20_spill]] }
  0x46   : > { %s1819_s2 = sld [smem:[#allocation21_spill]]  ;;  %s335_s15 = scalar_lea.vmem [#allocation8], %s1605_s14 }
  0x47   : > { %s1820_s30 = sld [smem:[#allocation12_spill]] }
  0x4a   : > { %s875_s21 = sshll.u32 %s1817_s29, 1 }
  0x4b   : > { %p340_p12 = scmp.lt.s32.totalorder %s875_s21, 3 }
  0x4d   : > { %s1849_s21 = smov (!%p340_p12, %s875_s21), 3  ;;  %p879_p1 = scmp.ne.s32.totalorder %s1820_s30, 0 }
  0x4e   : > { %s876_s12 = sshll.u32 %s1849_s21, 3 }
  0x4f   : > { %s1610_s16 = scalar_lea.vmem %s1818_s11, %s876_s12  ;;  %s1615_s0 = scalar_lea.vmem %s1819_s2, %s876_s12 }
  0x50   : > { %354 = sbr.rel (%p879_p1) target bundleno = 88 (0x58), region = 52 }
  0x55   : > { %v1381_v0 = vmov 0.0  }
  0x56   : > { %355 = vst [vmem:[#allocation2] sm:$0xff] %v1381_v0 }
  0x57   : > { %356 = vst [vmem:[#allocation2 + $0x8] sm:$0xff] %v1381_v0 }
  0x58 PF: > { %v971_v1 = vld [vmem:[%s1595_s8 + $0x38] sm:$0xff]  ;;  %v970_v3 = vld [vmem:[%s1595_s8 + $0x30] sm:$0xff]  ;;  %v969_v5 = vld [vmem:[%s1595_s8 + $0x28] sm:$0xff] }
  0x59   : > { %v979_v2 = vld [vmem:[%s1595_s8 + $0x78] sm:$0xff]  ;;  %499 = vmatpush.bf16.msra.mxu0 %v971_v1  ;;  %v978_v4 = vld [vmem:[%s1595_s8 + $0x70] sm:$0xff]  ;;  %v977_v6 = vld [vmem:[%s1595_s8 + $0x68] sm:$0xff] }
  0x5a   : > { %513 = vmatpush.bf16.msra.mxu1 %v979_v2  ;;  %v968_v7 = vld [vmem:[%s1595_s8 + $0x20] sm:$0xff]  ;;  %v967_v9 = vld [vmem:[%s1595_s8 + $0x18] sm:$0xff]  ;;  %v966_v11 = vld [vmem:[%s1595_s8 + $0x10] sm:$0xff] }
  0x5b   : > { %v976_v8 = vld [vmem:[%s1595_s8 + $0x60] sm:$0xff]  ;;  %v975_v10 = vld [vmem:[%s1595_s8 + $0x58] sm:$0xff]  ;;  %v974_v12 = vld [vmem:[%s1595_s8 + $0x50] sm:$0xff] }
  0x5c   : > { %v965_v13 = vld [vmem:[%s1595_s8 + $0x8] sm:$0xff]  ;;  %v964_v15 = vld [vmem:[%s1595_s8] sm:$0xff] }
  0x5d   : > { %500 = vmatpush.bf16.msra.mxu0 %v970_v3  ;;  %v973_v14 = vld [vmem:[%s1595_s8 + $0x48] sm:$0xff]  ;;  %v972_v16 = vld [vmem:[%s1595_s8 + $0x40] sm:$0xff]  ;;  %v357_v24 = vld [vmem:[#allocation2] sm:$0xff]  ;;  %s1821_s8 = sld [smem:[#allocation12_spill]] }
  0x5e   : > { %514 = vmatpush.bf16.msra.mxu1 %v978_v4  ;;  %v882_v17 = vld [vmem:[%s1588_s5] sm:$0xf]  ;;  %v963_v18 = vld [vmem:[%s1588_s5 + $0x4] sm:$0xf0]  ;;  %v962_v19 = vld [vmem:[%s1588_s5 + $0x4] sm:$0xf] }
  0x5f   : > { %v884_v20 = vld [vmem:[%s1588_s5 + $0x8] sm:$0xf0]  ;;  %v883_v21 = vor.u32 %v963_v18, %v882_v17 }
  0x60   : > { %v887_v22 = vor.u32 %v962_v19, %v884_v20  ;;  %v358_v29 = vld [vmem:[#allocation2 + $0x8] sm:$0xff] }
  0x61   : > { %501 = vmatpush.bf16.msra.mxu0 %v969_v5 }
  0x62   : > { %515 = vmatpush.bf16.msra.mxu1 %v977_v6 }
  0x63   : > { %p952_p3 = scmp.ne.s32.totalorder %s1821_s8, 3 }
  0x64   : > { %s1822_s21 = sld [smem:[#allocation19_spill]] (!%p952_p3) }
  0x65   : > { %502 = vmatpush.bf16.msra.mxu0 %v968_v7  ;;  %s1823_s12 = sld [smem:[#allocation13_spill]] (!%p952_p3) }
  0x66   : > { %516 = vmatpush.bf16.msra.mxu1 %v976_v8 }
  0x69   : > { %503 = vmatpush.bf16.msra.mxu0 %v967_v9 }
  0x6a   : > { %517 = vmatpush.bf16.msra.mxu1 %v975_v10 }
  0x6b   : > { %s953_s27 = sshll.u32 (!%p952_p3), %s1823_s12, 4 }
  0x6d   : > { %504 = vmatpush.bf16.msra.mxu0 %v966_v11 }
  0x6e   : > { %518 = vmatpush.bf16.msra.mxu1 %v974_v12 }
  0x71   : > { %505 = vmatpush.bf16.msra.mxu0 %v965_v13 }
  0x72   : > { %519 = vmatpush.bf16.msra.mxu1 %v973_v14 }
  0x75   : > { %506 = vmatpush.bf16.msra.mxu0 %v964_v15 }
  0x76   : > { %520 = vmatpush.bf16.msra.mxu1 %v972_v16 }
  0x78   : > { %507 = vmatmul.bf16.vlgmr.msra.gmra.mxu0 %v883_v21 }
  0x79   : > { %521 = vmatmul.bf16.vlgmr.msra.gmra.mxu1 %v887_v22 }
  0xf5   : > { %v508_v23 = vpop.f32.mrf.mxu0 }
  0xf6   : > { %v522_v25 = vpop.f32.mrf.mxu1 }
  0xf7   : > { %v523_v26 = vadd.f32 %v522_v25, %v508_v23 }
  0xf9   : > { %v527_v27 = vadd.f32 %v523_v26, %v357_v24 }
  0xfb   : > { %529 = vst [vmem:[#allocation2] sm:$0xff] %v527_v27 }
  0xfd   : > { %v510_v28 = vpop.f32.mrf.mxu0 }
  0xfe   : > { %v524_v30 = vpop.f32.mrf.mxu1 }
  0xff   : > { %v525_v31 = vadd.f32 %v524_v30, %v510_v28  ;;  %534 = sbr.rel (%p952_p3) target bundleno = 749 (0x2ed), region = 56 }
 0x101   : > { %v528_v32 = vadd.f32 %v525_v31, %v358_v29 }
 0x103   : > { %530 = vst [vmem:[#allocation2 + $0x8] sm:$0xff] %v528_v32 }
 0x104   : > { %v535_v33 = vlaneseq  ;;  %v549_v34 = vld [vmem:[%s1610_s16] sm:$0xff]  ;;  %v550_v41 = vld [vmem:[%s1610_s16 + $0x8] sm:$0xff]  ;;  %v1382_v52 = vmov 0  }
 0x105   : > { %v613_v35 = vld [vmem:[#allocation2] sm:$0xff]  ;;  %v621_v36 = vmul.f32 0.33333334, %v549_v34  ;;  %v622_v47 = vmul.f32 0.33333334, %v550_v41  ;;  %1130 = vset.pattern.permute.xlu1 %v1382_v52  ;;  %1129 = vset.pattern.permute.xlu0 %v1382_v52  ;;  %v576_v19 = vld [vmem:[%s1615_s0 + $0x8] sm:$0xff] }
 0x106   : > { %v1131_v37 = vld [vmem:[%s1822_s21] ss:$0 sm:$0xff]  ;;  %v1645_v38 = vand.u32 127, %v535_v33  ;;  %v1688_v31 = vshrl.u32 %v535_v33, 7 }
 0x107   : > { %v619_v40 = vadd.f32 %v1131_v37, %v613_v35  ;;  %v575_v20 = vld [vmem:[%s1615_s0] sm:$0xff] }
 0x108   : > { %vm540_vm0 = vcmp.lt.s32.totalorder %v1645_v38, 16  ;;  %vm706_vm9 = vcmp.eq.s32.totalorder %v1688_v31, 0  ;;  %vm707_vm10 = vcmp.eq.s32.totalorder %v1645_v38, 0 }
 0x109   : > { %v623_v42 = vsel %vm540_vm0, %v621_v36, -1e+30  ;;  %v551_v43 = vsel %vm540_vm0, %v549_v34, -1e+30  ;;  %v647_v44 = vmul.f32 0.33333334, %v619_v40  ;;  %v542_v40 = vstv %s953_s27  ;;  %vm708_vm11 = vmand %vm706_vm9, %vm707_vm10 }
 0x10a   : > { %v614_v39 = vld [vmem:[#allocation2 + $0x8] sm:$0xff]  ;;  %625 = vmax.xlane.f32.xlu1 %v623_v42  ;;  %553 = vmax.xlane.f32.xlu2 %v551_v43  ;;  %v624_v49 = vsel %vm540_vm0, %v622_v47, -1e+30  ;;  %v552_v50 = vsel %vm540_vm0, %v550_v41, -1e+30  ;;  %v539_v36 = vadd.s32 8, %v1688_v31 }
 0x10b   : > { %v620_v45 = vadd.f32 %v1131_v37, %v614_v39  ;;  %v649_v46 = vsel %vm540_vm0, %v647_v44, -1e+30 }
 0x10c   : > { %651 = vmax.xlane.f32.xlu0 %v649_v46  ;;  %v544_v47 = vadd.s32 %v542_v40, %v539_v36 }
 0x10d   : > { %v648_v48 = vmul.f32 0.33333334, %v620_v45 }
 0x10e   : > { %vm546_vm4 = vcmp.lt.s32.totalorder %v544_v47, 24 }
 0x10f   : > { %v650_v51 = vsel %vm540_vm0, %v648_v48, -1e+30  ;;  %vm548_vm6 = vmand %vm540_vm0, %vm546_vm4 }
 0x112   : > { %627 = vmax.xlane.f32.xlu1 %v624_v49  ;;  %555 = vmax.xlane.f32.xlu2 %v552_v50 }
 0x114   : > { %653 = vmax.xlane.f32.xlu0 %v650_v51 }
 0x17d   : > { %v626_v53 = vpop.xlane.xlu1 %625  ;;  %v554_v54 = vpop.xlane.xlu2 %553 }
 0x17e   : > { %v1661_v55 = vsub.f32 %v623_v42, %v626_v53  ;;  %v1663_v56 = vsub.f32 %v551_v43, %v554_v54  ;;  %v543_v42 = vadd.s32 %v542_v40, %v1688_v31  ;;  %v1383_v53 = vmov 0.0  }
 0x17f   : > { %v652_v57 = vpop.xlane.xlu0 %651 }
 0x180   : > { %v631_v58 = vmul.f32 1.442695, %v1661_v55  ;;  %v559_v59 = vmul.f32 1.442695, %v1663_v56  ;;  %v655_v2 = vsub.f32 %v649_v46, %v652_v57  ;;  %vm545_vm1 = vcmp.lt.s32.totalorder %v543_v42, 24 }
 0x181   : > { %vm1699_vm5 = vmand %vm540_vm0, %vm545_vm1 }
 0x182   : > { %1132 = vpow2.f32 %v631_v58  ;;  %v657_v10 = vmul.f32 1.442695, %v655_v2 }
 0x183   : > { %1134 = vpow2.f32 %v559_v59 }
 0x185   : > { %v628_v60 = vpop.xlane.xlu1 %627  ;;  %v556_v61 = vpop.xlane.xlu2 %555 }
 0x186   : > { %v1667_v62 = vsub.f32 %v624_v49, %v628_v60  ;;  %v1669_v63 = vsub.f32 %v552_v50, %v556_v61 }
 0x187   : > { %v654_v0 = vpop.xlane.xlu0 %653 }
 0x188   : > { %v1133_v1 = vpop.eup %1132  ;;  %v633_v3 = vmul.f32 1.442695, %v1667_v62  ;;  %v561_v4 = vmul.f32 1.442695, %v1669_v63  ;;  %v656_v5 = vsub.f32 %v650_v51, %v654_v0 }
 0x189   : > { %v1135_v6 = vpop.eup %1134  ;;  %v635_v7 = vsel %vm540_vm0, %v1133_v1, 0.0 }
 0x18a   : > { %1136 = vpow2.f32 %v633_v3  ;;  %v659_v8 = vmul.f32 1.442695, %v656_v5  ;;  %637 = vadd.xlane.f32.xlu2 %v635_v7  ;;  %v563_v9 = vsel %vm540_vm0, %v1135_v6, 0.0 }
 0x18b   : > { %1138 = vpow2.f32 %v561_v4  ;;  %565 = vadd.xlane.f32.xlu1 %v563_v9  ;;  %v1384_v9 = vmov 24.0  }
 0x18c   : > { %1140 = vpow2.f32 %v659_v8 }
 0x18d   : > { %1142 = vpow2.f32 %v657_v10 }
 0x190   : > { %v1137_v11 = vpop.eup %1136 }
 0x191   : > { %v1139_v12 = vpop.eup %1138  ;;  %v636_v13 = vsel %vm540_vm0, %v1137_v11, 0.0  ;;  %v1385_v11 = vmov 384.0  }
 0x192   : > { %v1141_v14 = vpop.eup %1140  ;;  %639 = vadd.xlane.f32.xlu0 %v636_v13  ;;  %v564_v15 = vsel %vm540_vm0, %v1139_v12, 0.0 }
 0x193   : > { %567 = vadd.xlane.f32.xlu2 %v564_v15  ;;  %v662_v16 = vsel %vm540_vm0, %v1141_v14, 0.0  ;;  %v1143_v17 = vpop.eup %1142 }
 0x194   : > { %665 = vadd.xlane.f32.xlu1 %v662_v16  ;;  %v661_v18 = vsel %vm540_vm0, %v1143_v17, 0.0 }
 0x19a   : > { %663 = vadd.xlane.f32.xlu0 %v661_v18 }
 0x1ad   : > { %581 = vperm.xlu1 %1130, %v576_v19  }
 0x1ae   : > { %578 = vperm.xlu0 %1129, %v575_v20  }
 0x1fd   : > { %v638_v23 = vpop.xlane.xlu2 %637 }
 0x1fe   : > { %v566_v21 = vpop.xlane.xlu1 %565 }
 0x205   : > { %v640_v22 = vpop.xlane.xlu0 %639 }
 0x206   : > { %v568_v26 = vpop.xlane.xlu2 %567 }
 0x207   : > { %v666_v24 = vpop.xlane.xlu1 %665 }
 0x208   : > { %1144 = vlog2.f32 %v666_v24 }
 0x20d   : > { %v664_v25 = vpop.xlane.xlu0 %663 }
 0x20e   : > { %1146 = vlog2.f32 %v664_v25  ;;  %v1145_v27 = vpop.eup %1144 }
 0x20f   : > { %1148 = vlog2.f32 %v568_v26  ;;  %v670_v29 = vmul.f32 0.6931472, %v1145_v27 }
 0x210   : > { %1150 = vlog2.f32 %v566_v21 }
 0x211   : > { %1152 = vlog2.f32 %v638_v23  ;;  %v672_v34 = vsub.f32 %v656_v5, %v670_v29 }
 0x212   : > { %1154 = vlog2.f32 %v640_v22 }
 0x213   : > { %v675_v45 = vmul.f32 1.442695, %v672_v34 }
 0x214   : > { %v1147_v28 = vpop.eup %1146 }
 0x215   : > { %v668_v30 = vmul.f32 0.6931472, %v1147_v28  ;;  %v1149_v35 = vpop.eup %1148 }
 0x216   : > { %v1151_v37 = vpop.eup %1150  ;;  %v572_v44 = vmul.f32 0.6931472, %v1149_v35 }
 0x217   : > { %v671_v32 = vsub.f32 %v655_v2, %v668_v30  ;;  %v1153_v41 = vpop.eup %1152  ;;  %v570_v46 = vmul.f32 0.6931472, %v1151_v37 }
 0x218   : > { %v1155_v43 = vpop.eup %1154  ;;  %v642_v33 = vmul.f32 0.6931472, %v1153_v41  ;;  %v574_v50 = vsub.f32 %v1669_v63, %v572_v44 }
 0x219   : > { %v673_v39 = vmul.f32 1.442695, %v671_v32  ;;  %v644_v48 = vmul.f32 0.6931472, %v1155_v43  ;;  %v573_v52 = vsub.f32 %v1663_v56, %v570_v46 }
 0x21a   : > { %v645_v60 = vsub.f32 %v1661_v55, %v642_v33 }
 0x21b   : > { %1156 = vpow2.f32 %v673_v39  ;;  %v646_v61 = vsub.f32 %v1667_v62, %v644_v48 }
 0x21c   : > { %1158 = vpow2.f32 %v675_v45  ;;  %v677_v56 = vsub.f32 %v671_v32, %v645_v60 }
 0x21d   : > { %v678_v5 = vsub.f32 %v672_v34, %v646_v61  ;;  %1160 = vrcp.f32 %v1384_v9 }
 0x21e   : > { %1162 = vrcp.f32 %v1385_v11 }
 0x21f   : > { %v582_v49 = vpop.permute.xlu1 %581 }
 0x220   : > { %vm584_vm2 = vcmp.eq.s32.totalorder %v1645_v38, %v582_v49  ;;  %v579_v51 = vpop.permute.xlu0 %578 }
 0x221   : > { %v955_v54 = vsel %vm584_vm2, 1.0, %v1383_v53  ;;  %vm583_vm3 = vcmp.eq.s32.totalorder %v1645_v38, %v579_v51  ;;  %v1157_v0 = vpop.eup %1156 }
 0x222   : > { %v590_v57 = vmul.f32 %v955_v54, %v574_v50  ;;  %v954_v58 = vsel %vm583_vm3, 1.0, %v1383_v53  ;;  %v1159_v3 = vpop.eup %1158  ;;  %v679_v6 = vmul.f32 %v1157_v0, %v677_v56 }
 0x223   : > { %v589_v63 = vmul.f32 %v954_v58, %v573_v52  ;;  %v680_v7 = vmul.f32 %v1159_v3, %v678_v5  ;;  %v1161_v10 = vpop.eup %1160 }
 0x224   : > { %v592_v2 = vsel %vm548_vm6, %v590_v57, 0.0  ;;  %v681_v55 = vsel %vm1699_vm5, %v679_v6, 0.0  ;;  %v605_v12 = vmul.f32 24.0, %v1161_v10  ;;  %v1163_v14 = vpop.eup %1162  ;;  %vm609_vm7 = vweird.f32 %v1161_v10 }
 0x225   : > { %v591_v1 = vsel %vm1699_vm5, %v589_v63, 0.0  ;;  %v682_v62 = vsel %vm548_vm6, %v680_v7, 0.0  ;;  %v695_v19 = vmul.f32 384.0, %v1163_v14  ;;  %vm699_vm8 = vweird.f32 %v1163_v14 }
 0x226   : > { %v593_v4 = vadd.f32 %v592_v2, %v591_v1  ;;  %v683_v8 = vadd.f32 %v682_v62, %v681_v55  ;;  %v606_v13 = vsub.f32 1.0, %v605_v12 }
 0x227   : > { %v696_v23 = vsub.f32 1.0, %v695_v19 }
 0x228   : > { %594 = vadd.xlane.f32.xlu2 %v593_v4  ;;  %v607_v18 = vmul.f32 %v1161_v10, %v606_v13 }
 0x229   : > { %v697_v30 = vmul.f32 %v1163_v14, %v696_v23 }
 0x22a   : > { %v608_v22 = vadd.f32 %v1161_v10, %v607_v18 }
 0x22b   : > { %v698_v35 = vadd.f32 %v1163_v14, %v697_v30 }
 0x22c   : > { %v610_v29 = vsel %vm609_vm7, %v1161_v10, %v608_v22 }
 0x22d   : > { %v700_v39 = vsel %vm699_vm8, %v1163_v14, %v698_v35 }
 0x230   : > { %684 = vadd.xlane.f32.xlu2 %v683_v8 }
 0x29b   : > { %v595_v15 = vpop.xlane.xlu2 %594 }
 0x29c   : > { %v596_v16 = vrot.slane %v595_v15, 4 }
 0x29e   : > { %v597_v17 = vadd.f32 %v596_v16, %v595_v15 }
 0x2a0   : > { %v598_v20 = vrot.slane %v597_v17, 2 }
 0x2a2   : > { %v599_v21 = vadd.f32 %v598_v20, %v597_v17 }
 0x2a3   : > { %v685_v24 = vpop.xlane.xlu2 %684 }
 0x2a4   : > { %v686_v25 = vrot.slane %v685_v24, 4  ;;  %v600_v26 = vrot.slane %v599_v21, 1 }
 0x2a6   : > { %v687_v27 = vadd.f32 %v686_v25, %v685_v24  ;;  %v601_v28 = vadd.f32 %v600_v26, %v599_v21 }
 0x2a8   : > { %v688_v32 = vrot.slane %v687_v27, 2  ;;  %980 = vpush %v601_v28 }
 0x2a9   : > { %982 = vpush %v610_v29 }
 0x2aa   : > { %v689_v34 = vadd.f32 %v688_v32, %v687_v27 }
 0x2ac   : > { %v690_v36 = vrot.slane %v689_v34, 1 }
 0x2ae   : > { %v691_v37 = vadd.f32 %v690_v36, %v689_v34 }
 0x2b0   : > { %984 = vpush %v691_v37 }
 0x2b1   : > { %986 = vpush %v700_v39 }
 0x2d9   : > { %s981_s13 = spop %980 }
 0x2da   : > { %s603_s11 = ssub.f32 0.0, %s981_s13  ;;  %s983_s16 = spop %982 }
 0x2dc   : > { %s612_s3 = smul.f32 %s983_s16, %s603_s11 }
 0x2de   : > { %s703_s8 = smul.f32 0.5, %s612_s3 }
 0x2e1   : > { %s985_s9 = spop %984 }
 0x2e2   : > { %s693_s2 = smul.f32 9.0, %s985_s9  ;;  %s987_s0 = spop %986 }
 0x2e4   : > { %s702_s30 = smul.f32 %s987_s0, %s693_s2 }
 0x2e6   : > { %s704_s5 = smul.f32 0.5, %s702_s30 }
 0x2e8   : > { %s705_s29 = sadd.f32 %s704_s5, %s703_s8 }
 0x2ea   : > { %v709_v40 = vstv %s705_s29 }
 0x2eb   : > { %v710_v41 = vsel %vm708_vm11, %v709_v40, 0.0 }
 0x2ec   : > { %711 = vst [vmem:[%s335_s15] sm:$0xff] %v710_v41 }
 0x2ed PF: > { %s1826_s21 = sld [smem:[#allocation13_spill]]  ;;  %s725_s3 = sshll.u32 %s335_s15, 4  ;;  %s726_s3 = int_to_ptr.vmem [resolvable:$true] %s725_s3 }
 0x2ee   : > { %s1827_s11 = sld [smem:[#allocation22_spill]]  ;;  %s713_s2 = scalar_lea.sflag [#allocation5], %s333_s28 }
 0x2f3   : > { %s957_s12 = sshll.u32 %s1826_s21, 3 }
 0x2f4   : > { %s723_s16 = scalar_lea.hbm %s1827_s11, %s957_s12  ;;  %s1244_s29 = scalar_lea.hbm %s1827_s11, 16 }
 0x2f5   : > { %s727_s9 = sshll.u32 %s723_s16, 4  ;;  %s728_s9 = int_to_ptr.hbm [resolvable:$true] %s727_s9 }
 0x2f6   : > { %s1238_s0 = sshra.s32 %s728_s9, 4  ;;  %s1239_s0 = int_to_ptr.hbm [resolvable:$true] %s1238_s0 }
 0x2f7   : > { %s1240_s30 = scalar_lea.hbm %s1239_s0, 8  ;;  %p1245_p9 = scmp.lt.s32.totalorder %s1239_s0, %s1827_s11 }
 0x2f8   : > { %p1241_p4 = scmp.ne.s32.totalorder %s1239_s0, %s1240_s30  ;;  %p1246_p10 = scmp.lt.s32.totalorder %s1244_s29, %s1240_s30 }
 0x2fa   : > { %p1242_p7 = pnand %p1241_p4, %p1568_p6  ;;  %p1247_p5 = por %p1246_p10, %p1245_p9 }
 0x2fc   : > { %p1243_p8 = pneg %p1242_p7 }
 0x2fe   : > { %p1248_p11 = pnand %p1247_p5, %p1243_p8 }
 0x300   : > { %1251 = shalt.err (!%p1248_p11)
}
 0x301   : > { %992 = dma.vmem_to_hbm [thread:$0]  (%p1568_p6), %s726_s3, 128, %s728_s9, %s713_s2  }
 0x302 PF: > { %p1006_p2 = scmp.ge.s32.totalorder %s1374_s6, 2  ;;  %s739_s28 = sand.u32 1, %s1322_s18  }
 0x303   : > { %s740_s14 = scalar_lea.sflag [#allocation5], %s739_s28 }
 0x304   : > { %p1002_p13 = pnand %p1006_p2, %p1573_p0 }
 0x306   : > { %p1003_p12 = pneg %p1002_p13 }
 0x308   : > { %1317 = dma.done.wait (%p1003_p12), %s740_s14, 128  }
 0x309   : > { %1319 = vsyncadd (%p1003_p12), %s740_s14, 4294967168  ;;  %s24_s6 = sadd.s32 1, %s1374_s6   ;;  %s1829_s27 = sld [smem:[#allocation14_spill]] }
 0x30a   : > { %p1738_p1 = scmp.ge.s32.totalorder %s24_s6, 10   ;;  %s1830_s28 = sld [smem:[#allocation15_spill]] }
 0x30b   : > { %s1831_s29 = sld [smem:[#allocation16_spill]]  ;;  %s1833_s18 = smov %s1326_s19 }
 0x30c   : > { %s1832_s30 = sld [smem:[#allocation17_spill]]  ;;  %s1834_s19 = smov %s1330_s20 }
 0x30d   : > { %s1835_s20 = smov %s1516_s17  ;;  %s1836_s21 = smov %s1338_s22 }
 0x30e   : > { %s1837_s22 = smov %s1342_s23  ;;  %s1838_s23 = smov %s1552_s4 }
 0x30f   : > { %s1839_s24 = smov %s1350_s25  ;;  %s1840_s25 = smov %s1354_s26 }
 0x310   : > { %s1841_s26 = smov %s1519_s7  ;;  %23 = sbr.rel (!%p1738_p1) target bundleno = 18 (0x12), region = 112 }
 0x315   :  { %746 = vsyncpa [#allocation4], 1 }
 0x316   :  { %748 = vsyncpa [#allocation4 + $0x1], 1 }
 0x317   :  { %749 = vsyncpa [#allocation7], 1 }
 0x318   :  { %751 = vsyncpa [#allocation7 + $0x1], 1 }
 0x319   :  { %752 = vsyncpa [#allocation5], 1 }
 0x31a   :  { %754 = vsyncpa [#allocation5 + $0x1], 1 }

</bundles_post_ra>
